<compile_context>
chip_gen: v7x
topology: tpu7x:2x2x1
jax: 0.10.0
libtpu: 0.0.40
codegen_flags: <defaults>
</compile_context>

<pallas_src>
import functools

import jax
import jax.numpy as jnp
from jax import lax
from jax.experimental import pallas as pl
from jax.experimental.pallas import tpu as pltpu


def _device_kind() -> str:
    try:
        return jax.devices()[0].device_kind.lower()
    except Exception:
        return ""


def _default_compute_dtype():
    kind = _device_kind()
    # v5e and older: no bf16 VPU/EUP -> bf16 on the serial path would insert converts.
    for old in ("v2", "v3", "v4", "v5"):
        if old in kind:
            return jnp.float32
    return jnp.bfloat16 if kind else jnp.float32


def _is_dual_tensorcore() -> bool:
    kind = _device_kind()
    return any(tag in kind for tag in ("v7", "tpu7", "7x"))


def lstm_fc_kernel(gx_ref, whh_ref, wfc_ref, bfc_ref, out_ref, h_scr, c_scr,
                   *, seq_len, need_mask):
    """One (batch block, time block) of the LSTM recurrence (+ FC on the last time block).

    gx_ref : (T_BLK, B_BLK, 4H) precomputed x @ W_ih^T + (b_ih + b_hh), gate order i,f,g,o.
    whh_ref: (H, 4H)  fused, transposed recurrent weights (h @ whh -> all four gates).
    wfc_ref: (H, Cp)  classifier weights, transposed, lane-padded.
    bfc_ref: (1, Cp)  classifier bias, lane-padded.
    out_ref: (B_BLK, Cp) logits (lane-dense), written on the last time block only.
    h_scr  : (B_BLK, H) hidden state, persistent across time blocks.
    c_scr  : (B_BLK, H) cell state,  persistent across time blocks.
    """
    t_blk = gx_ref.shape[0]
    b_blk, hidden = h_scr.shape
    t_id = pl.program_id(1)
    n_t = pl.num_programs(1)

    @pl.when(t_id == 0)
    def _init():
        h_scr[...] = jnp.zeros_like(h_scr)
        c_scr[...] = jnp.zeros_like(c_scr)

    # Hoisted out of the serial loop: fused recurrent weights + gate lane mask.
    whh = whh_ref[...]                                            # (H, 4H)
    lane = lax.broadcasted_iota(jnp.int32, (b_blk, 4 * hidden), 1)
    is_g = jnp.logical_and(lane >= 2 * hidden, lane < 3 * hidden)  # tanh lanes (g gate)

    def make_step(masked):
        def step(t, carry):
            h = h_scr[...]
            c = c_scr[...]
            # Single fused (B_BLK, H) x (H, 4H) MXU matmul per step; f32 accumulation.
            g_pre = gx_ref[t] + jnp.dot(h.astype(whh.dtype), whh,
                                        preferred_element_type=jnp.float32)
            # sigmoid(x) = 0.5*tanh(0.5*x) + 0.5  ->  one full-width tanh covers all gates;
            # the g-gate lanes keep plain tanh via the lane mask.
            tan = jnp.tanh(jnp.where(is_g, g_pre, 0.5 * g_pre))
            act = jnp.where(is_g, tan, 0.5 * tan + 0.5)
            i_g = act[:, 0 * hidden:1 * hidden]
            f_g = act[:, 1 * hidden:2 * hidden]
            g_g = act[:, 2 * hidden:3 * hidden]
            o_g = act[:, 3 * hidden:4 * hidden]
            c_new = f_g * c + i_g * g_g
            h_new = o_g * jnp.tanh(c_new)
            if masked:   # traced only for the padded tail block
                valid = (t_id * t_blk + t) < seq_len
                c_new = jnp.where(valid, c_new, c)
                h_new = jnp.where(valid, h_new, h)
            c_scr[...] = c_new
            h_scr[...] = h_new
            return carry
        return step

    unroll = True if t_blk <= 32 else 16
    if need_mask:
        @pl.when(t_id < n_t - 1)
        def _hot():
            lax.fori_loop(0, t_blk, make_step(False), 0, unroll=unroll)

        @pl.when(t_id == n_t - 1)
        def _tail():
            lax.fori_loop(0, t_blk, make_step(True), 0, unroll=unroll)
    else:
        lax.fori_loop(0, t_blk, make_step(False), 0, unroll=unroll)

    @pl.when(t_id == n_t - 1)
    def _finalize():
        out_ref[...] = (
            jnp.dot(h_scr[...], wfc_ref[...], preferred_element_type=jnp.float32)
            + bfc_ref[...]
        ).astype(out_ref.dtype)


@functools.partial(jax.jit, static_argnames=("compute_dtype",))
def email_classifier_forward(text, params, compute_dtype=None):
    """Equivalent of EmailClassifier.forward(text) (batch_first=True)."""
    if compute_dtype is None:
        compute_dtype = _default_compute_dtype()

    emb_table = params["embedding"]          # (V, E)
    w_ih = params["w_ih"]                    # (4H, E)  PyTorch layout, gate order i,f,g,o
    w_hh = params["w_hh"]                    # (4H, H)
    b_ih = params["b_ih"]                    # (4H,)
    b_hh = params["b_hh"]                    # (4H,)
    w_fc = params["w_fc"]                    # (C, H)
    b_fc = params["b_fc"]                    # (C,)

    B, T = text.shape
    H = w_hh.shape[1]
    C = w_fc.shape[0]

    # Batch-parallel grid axis only where it can pay off (dual-TC chips, enough batch).
    n_b_blk = 2 if (_is_dual_tensorcore() and B > 8) else 1
    Bp = pl.cdiv(B, 8 * n_b_blk) * (8 * n_b_blk)   # sublane-aligned, splittable batch
    B_BLK = Bp // n_b_blk
    Cp = pl.cdiv(C, 128) * 128                     # lane-dense logits

    # VMEM-budget-derived time block: double-buffered gx stream must stay well under the
    # smallest physical VMEM (v7x: 64 MiB; practical scoped ceiling ~48 MiB).
    cd_bytes = jnp.dtype(compute_dtype).itemsize
    per_step_bytes = B_BLK * 4 * H * cd_bytes
    gx_budget = 24 * 1024 * 1024
    t_blk_cap = max(1, gx_budget // (2 * per_step_bytes))
    T_BLK = int(max(1, min(T, 512, t_blk_cap)))
    T_pad = pl.cdiv(T, T_BLK) * T_BLK
    n_t_blk = T_pad // T_BLK

    fixed_bytes = (H * 4 * H + H * Cp + Cp + B_BLK * Cp + 2 * B_BLK * H) * 4
    vmem_limit = int(min(48 * 1024 * 1024,
                         max(32 * 1024 * 1024,
                             2 * T_BLK * per_step_bytes + fixed_bytes + 2 * 1024 * 1024)))

    # Fused embedding gather + time-major layout: (T, B, E).
    x_tm = jnp.take(emb_table, text.T, axis=0)

    # Hoisted input projection in its FINAL fused-gate layout (T, B, 4H): one XLA matmul,
    # no reshape/transpose copies; only the tiny batch / tail-T pad.
    bias = (b_ih + b_hh).astype(jnp.float32)
    gx = jnp.einsum("tbe,ge->tbg", x_tm, w_ih,
                    preferred_element_type=jnp.float32) + bias
    gx = gx.astype(compute_dtype)
    gx = jnp.pad(gx, ((0, T_pad - T), (0, Bp - B), (0, 0)))

    # Fused, transposed recurrent weights: h @ whh_all -> (B, 4H) gate pre-activations.
    whh_all = w_hh.T.astype(compute_dtype)                       # (H, 4H)

    # Lane-padded classifier weights / bias (f32 — one-time epilogue).
    wfc_t = jnp.zeros((H, Cp), jnp.float32).at[:, :C].set(w_fc.T)
    bfc_p = jnp.zeros((1, Cp), jnp.float32).at[:, :C].set(b_fc)

    kernel = functools.partial(lstm_fc_kernel, seq_len=T, need_mask=(T_pad != T))

    out_padded = pl.pallas_call(
        kernel,
        out_shape=jax.ShapeDtypeStruct((Bp, Cp), jnp.float32),
        grid_spec=pltpu.PrefetchScalarGridSpec(
            num_scalar_prefetch=0,
            grid=(n_b_blk, n_t_blk),
            in_specs=[
                pl.BlockSpec((T_BLK, B_BLK, 4 * H), lambda b, t: (t, b, 0)),
                pl.BlockSpec((H, 4 * H), lambda b, t: (0, 0)),
                pl.BlockSpec((H, Cp), lambda b, t: (0, 0)),
                pl.BlockSpec((1, Cp), lambda b, t: (0, 0)),
            ],
            out_specs=pl.BlockSpec((B_BLK, Cp), lambda b, t: (b, 0)),
            scratch_shapes=[
                pltpu.VMEM((B_BLK, H), jnp.float32),   # h state
                pltpu.VMEM((B_BLK, H), jnp.float32),   # c state
            ],
        ),
        compiler_params=pltpu.CompilerParams(
            dimension_semantics=("parallel", "arbitrary"),   # batch parallel, time serial
            vmem_limit_bytes=vmem_limit,
        ),
    )(gx, whh_all, wfc_t, bfc_p)

    logits = out_padded[:B, :C]
    # PyTorch: self.fc(hidden[0]).squeeze()
    return jnp.squeeze(logits)


def reference_forward(text, params):
    """Pure-JAX reference replicating PyTorch LSTM semantics."""
    emb = jnp.take(params["embedding"], text, axis=0)    # (B, T, E)
    H = params["w_hh"].shape[1]
    w_ih_t = params["w_ih"].T
    w_hh_t = params["w_hh"].T
    bias = params["b_ih"] + params["b_hh"]

    def cell(carry, x_t):
        h, c = carry
        gates = x_t @ w_ih_t + h @ w_hh_t + bias
        i = jax.nn.sigmoid(gates[:, 0 * H:1 * H])
        f = jax.nn.sigmoid(gates[:, 1 * H:2 * H])
        g = jnp.tanh(gates[:, 2 * H:3 * H])
        o = jax.nn.sigmoid(gates[:, 3 * H:4 * H])
        c_new = f * c + i * g
        h_new = o * jnp.tanh(c_new)
        return (h_new, c_new), None

    B = text.shape[0]
    h0 = jnp.zeros((B, H), jnp.float32)
    c0 = jnp.zeros((B, H), jnp.float32)
    (h_T, _), _ = lax.scan(cell, (h0, c0), jnp.transpose(emb, (1, 0, 2)))
    return jnp.squeeze(h_T @ params["w_fc"].T + params["b_fc"])


def init_params(key, vocab_size, embed_size, hidden_size, num_class):
    ks = jax.random.split(key, 7)
    k_lstm = 1.0 / jnp.sqrt(hidden_size)
    k_fc = 1.0 / jnp.sqrt(hidden_size)
    return {
        "embedding": jax.random.normal(ks[0], (vocab_size, embed_size), jnp.float32),
        "w_ih": jax.random.uniform(ks[1], (4 * hidden_size, embed_size),
                                   jnp.float32, -k_lstm, k_lstm),
        "w_hh": jax.random.uniform(ks[2], (4 * hidden_size, hidden_size),
                                   jnp.float32, -k_lstm, k_lstm),
        "b_ih": jax.random.uniform(ks[3], (4 * hidden_size,),
                                   jnp.float32, -k_lstm, k_lstm),
        "b_hh": jax.random.uniform(ks[4], (4 * hidden_size,),
                                   jnp.float32, -k_lstm, k_lstm),
        "w_fc": jax.random.uniform(ks[5], (num_class, hidden_size),
                                   jnp.float32, -k_fc, k_fc),
        "b_fc": jax.random.uniform(ks[6], (num_class,),
                                   jnp.float32, -k_fc, k_fc),
    }


if __name__ == "__main__":
    VOCAB, EMBED, HIDDEN, NUM_CLASS = 50, 32, 32, 4
    B, T = 2, 8

    key = jax.random.PRNGKey(0)
    k_params, k_text = jax.random.split(key)
    params = init_params(k_params, VOCAB, EMBED, HIDDEN, NUM_CLASS)
    text = jax.random.randint(k_text, (B, T), 0, VOCAB, dtype=jnp.int32)

    ref = reference_forward(text, params)

    # f32 path: tight check against the PyTorch-equivalent reference.
    out = email_classifier_forward(text, params, compute_dtype=jnp.float32)
    out = jax.block_until_ready(out)
    assert out.shape == (B, NUM_CLASS), out.shape
    assert jnp.allclose(out, ref, atol=1e-4, rtol=1e-4), (out, ref)

    # Device-default path (bf16 gx/W_hh on v6e/v7x, f32 elsewhere): loose check.
    out_auto = jax.block_until_ready(email_classifier_forward(text, params))
    assert out_auto.shape == (B, NUM_CLASS), out_auto.shape
    assert jnp.allclose(out_auto, ref, atol=5e-2, rtol=5e-2), (out_auto, ref)

    print("KERNEL_OK")
</pallas_src>

<mosaic_0001>
module attributes {stable_mosaic.version = 11 : i64} {
  func.func @lstm_fc_kernel(%arg0: i32, %arg1: i32, %arg2: memref<8x8x128xf32, #tpu.memory_space<vmem>>, %arg3: memref<32x128xf32, #tpu.memory_space<vmem>>, %arg4: memref<32x128xf32, #tpu.memory_space<vmem>>, %arg5: memref<1x128xf32, #tpu.memory_space<vmem>>, %arg6: memref<8x128xf32, #tpu.memory_space<vmem>>, %arg7: memref<8x32xf32, #tpu.memory_space<vmem>>, %arg8: memref<8x32xf32, #tpu.memory_space<vmem>>) attributes {dimension_semantics = [#tpu.dimension_semantics<parallel>, #tpu.dimension_semantics<arbitrary>], iteration_bounds = array<i64: 1, 1>, scalar_prefetch = 0 : i64, scratch_operands = 2 : i64, tpu.core_type = #tpu.core_type<tc>, window_params = [{transform_indices = @transform_0, window_bounds = array<i64: 8, 8, 128>}, {pipeline_mode = #tpu.pipeline_mode<synchronous>, transform_indices = @transform_1, window_bounds = array<i64: 32, 128>}, {pipeline_mode = #tpu.pipeline_mode<synchronous>, transform_indices = @transform_2, window_bounds = array<i64: 32, 128>}, {pipeline_mode = #tpu.pipeline_mode<synchronous>, transform_indices = @transform_3, window_bounds = array<i64: 1, 128>}, {transform_indices = @transform_4, window_bounds = array<i64: 8, 128>}]} {
    %c0_i32 = arith.constant 0 : i32
    %0 = arith.cmpi eq, %arg1, %c0_i32 : i32
    %1 = arith.extui %0 : i1 to i32
    %c0_i32_0 = arith.constant 0 : i32
    %2 = arith.cmpi ne, %1, %c0_i32_0 : i32
    scf.if %2 {
      %cst_116 = arith.constant 0.000000e+00 : f32
      %229 = vector.broadcast %cst_116 : f32 to vector<8x32xf32>
      %c0_117 = arith.constant 0 : index
      %c0_118 = arith.constant 0 : index
      %230 = vector.load %arg7[%c0_117, %c0_118] : memref<8x32xf32, #tpu.memory_space<vmem>>, vector<8x32xf32>
      tpu.vector_store %arg7[%c0_117, %c0_118], %229 {strides = array<i32>} : memref<8x32xf32, #tpu.memory_space<vmem>>, vector<8x32xf32>,
      %cst_119 = arith.constant 0.000000e+00 : f32
      %231 = vector.broadcast %cst_119 : f32 to vector<8x32xf32>
      %c0_120 = arith.constant 0 : index
      %c0_121 = arith.constant 0 : index
      %232 = vector.load %arg8[%c0_120, %c0_121] : memref<8x32xf32, #tpu.memory_space<vmem>>, vector<8x32xf32>
      tpu.vector_store %arg8[%c0_120, %c0_121], %231 {strides = array<i32>} : memref<8x32xf32, #tpu.memory_space<vmem>>, vector<8x32xf32>,
    } else {
    }
    %c0 = arith.constant 0 : index
    %c0_1 = arith.constant 0 : index
    %3 = vector.load %arg3[%c0, %c0_1] : memref<32x128xf32, #tpu.memory_space<vmem>>, vector<32x128xf32>
    %4 = tpu.iota {dimensions = array<i32: 1>} : vector<8x128xi32>
    %c64_i32 = arith.constant 64 : i32
    %5 = vector.broadcast %c64_i32 : i32 to vector<8x128xi32>
    %6 = arith.cmpi sge, %4, %5 : vector<8x128xi32>
    %c96_i32 = arith.constant 96 : i32
    %7 = vector.broadcast %c96_i32 : i32 to vector<8x128xi32>
    %8 = arith.cmpi slt, %4, %7 : vector<8x128xi32>
    %9 = arith.andi %6, %8 : vector<8x128xi1>
    %c0_i32_2 = arith.constant 0 : i32
    %c0_3 = arith.constant 0 : index
    %c0_4 = arith.constant 0 : index
    %10 = vector.load %arg7[%c0_3, %c0_4] : memref<8x32xf32, #tpu.memory_space<vmem>>, vector<8x32xf32>
    %c0_5 = arith.constant 0 : index
    %c0_6 = arith.constant 0 : index
    %11 = vector.load %arg8[%c0_5, %c0_6] : memref<8x32xf32, #tpu.memory_space<vmem>>, vector<8x32xf32>
    %12 = arith.index_cast %c0_i32_2 : i32 to index
    %c0_7 = arith.constant 0 : index
    %c0_8 = arith.constant 0 : index
    %13 = vector.load %arg2[%12, %c0_7, %c0_8] : memref<8x8x128xf32, #tpu.memory_space<vmem>>, vector<1x8x128xf32>
    %14 = vector.shape_cast %13 : vector<1x8x128xf32> to vector<8x128xf32>
    %cst = arith.constant dense<0.000000e+00> : vector<8x128xf32>
    %15 = tpu.matmul %10, %3, %cst {dimension_numbers = #tpu.dot_dimension_numbers<[1], [0], [0], [1], [0, 0, 1, 1], [], []>} : vector<8x32xf32>, vector<32x128xf32>, vector<8x128xf32> -> vector<8x128xf32>
    %16 = arith.addf %14, %15 : vector<8x128xf32>
    %cst_9 = arith.constant 5.000000e-01 : f32
    %17 = vector.broadcast %cst_9 : f32 to vector<8x128xf32>
    %18 = arith.mulf %17, %16 : vector<8x128xf32>
    %19 = arith.select %9, %16, %18 : vector<8x128xi1>, vector<8x128xf32>
    %20 = math.tanh %19 : vector<8x128xf32>
    %cst_10 = arith.constant 5.000000e-01 : f32
    %21 = vector.broadcast %cst_10 : f32 to vector<8x128xf32>
    %22 = arith.mulf %21, %20 : vector<8x128xf32>
    %cst_11 = arith.constant 5.000000e-01 : f32
    %23 = vector.broadcast %cst_11 : f32 to vector<8x128xf32>
    %24 = arith.addf %22, %23 : vector<8x128xf32>
    %25 = arith.select %9, %20, %24 : vector<8x128xi1>, vector<8x128xf32>
    %26 = vector.extract_strided_slice %25 {offsets = [0, 0], sizes = [8, 32], strides = [1, 1]} : vector<8x128xf32> to vector<8x32xf32>
    %27 = vector.extract_strided_slice %25 {offsets = [0, 32], sizes = [8, 32], strides = [1, 1]} : vector<8x128xf32> to vector<8x32xf32>
    %28 = vector.extract_strided_slice %25 {offsets = [0, 64], sizes = [8, 32], strides = [1, 1]} : vector<8x128xf32> to vector<8x32xf32>
    %29 = vector.extract_strided_slice %25 {offsets = [0, 96], sizes = [8, 32], strides = [1, 1]} : vector<8x128xf32> to vector<8x32xf32>
    %30 = arith.mulf %27, %11 : vector<8x32xf32>
    %31 = arith.mulf %26, %28 : vector<8x32xf32>
    %32 = arith.addf %30, %31 : vector<8x32xf32>
    %33 = math.tanh %32 : vector<8x32xf32>
    %34 = arith.mulf %29, %33 : vector<8x32xf32>
    %c0_12 = arith.constant 0 : index
    %c0_13 = arith.constant 0 : index
    %35 = vector.load %arg8[%c0_12, %c0_13] : memref<8x32xf32, #tpu.memory_space<vmem>>, vector<8x32xf32>
    tpu.vector_store %arg8[%c0_12, %c0_13], %32 {strides = array<i32>} : memref<8x32xf32, #tpu.memory_space<vmem>>, vector<8x32xf32>,
    %c0_14 = arith.constant 0 : index
    %c0_15 = arith.constant 0 : index
    %36 = vector.load %arg7[%c0_14, %c0_15] : memref<8x32xf32, #tpu.memory_space<vmem>>, vector<8x32xf32>
    tpu.vector_store %arg7[%c0_14, %c0_15], %34 {strides = array<i32>} : memref<8x32xf32, #tpu.memory_space<vmem>>, vector<8x32xf32>,
    %c1_i32 = arith.constant 1 : i32
    %c0_16 = arith.constant 0 : index
    %c0_17 = arith.constant 0 : index
    %37 = vector.load %arg7[%c0_16, %c0_17] : memref<8x32xf32, #tpu.memory_space<vmem>>, vector<8x32xf32>
    %c0_18 = arith.constant 0 : index
    %c0_19 = arith.constant 0 : index
    %38 = vector.load %arg8[%c0_18, %c0_19] : memref<8x32xf32, #tpu.memory_space<vmem>>, vector<8x32xf32>
    %39 = arith.index_cast %c1_i32 : i32 to index
    %c0_20 = arith.constant 0 : index
    %c0_21 = arith.constant 0 : index
    %40 = vector.load %arg2[%39, %c0_20, %c0_21] : memref<8x8x128xf32, #tpu.memory_space<vmem>>, vector<1x8x128xf32>
    %41 = vector.shape_cast %40 : vector<1x8x128xf32> to vector<8x128xf32>
    %cst_22 = arith.constant dense<0.000000e+00> : vector<8x128xf32>
    %42 = tpu.matmul %37, %3, %cst_22 {dimension_numbers = #tpu.dot_dimension_numbers<[1], [0], [0], [1], [0, 0, 1, 1], [], []>} : vector<8x32xf32>, vector<32x128xf32>, vector<8x128xf32> -> vector<8x128xf32>
    %43 = arith.addf %41, %42 : vector<8x128xf32>
    %cst_23 = arith.constant 5.000000e-01 : f32
    %44 = vector.broadcast %cst_23 : f32 to vector<8x128xf32>
    %45 = arith.mulf %44, %43 : vector<8x128xf32>
    %46 = arith.select %9, %43, %45 : vector<8x128xi1>, vector<8x128xf32>
    %47 = math.tanh %46 : vector<8x128xf32>
    %cst_24 = arith.constant 5.000000e-01 : f32
    %48 = vector.broadcast %cst_24 : f32 to vector<8x128xf32>
    %49 = arith.mulf %48, %47 : vector<8x128xf32>
    %cst_25 = arith.constant 5.000000e-01 : f32
    %50 = vector.broadcast %cst_25 : f32 to vector<8x128xf32>
    %51 = arith.addf %49, %50 : vector<8x128xf32>
    %52 = arith.select %9, %47, %51 : vector<8x128xi1>, vector<8x128xf32>
    %53 = vector.extract_strided_slice %52 {offsets = [0, 0], sizes = [8, 32], strides = [1, 1]} : vector<8x128xf32> to vector<8x32xf32>
    %54 = vector.extract_strided_slice %52 {offsets = [0, 32], sizes = [8, 32], strides = [1, 1]} : vector<8x128xf32> to vector<8x32xf32>
    %55 = vector.extract_strided_slice %52 {offsets = [0, 64], sizes = [8, 32], strides = [1, 1]} : vector<8x128xf32> to vector<8x32xf32>
    %56 = vector.extract_strided_slice %52 {offsets = [0, 96], sizes = [8, 32], strides = [1, 1]} : vector<8x128xf32> to vector<8x32xf32>
    %57 = arith.mulf %54, %38 : vector<8x32xf32>
    %58 = arith.mulf %53, %55 : vector<8x32xf32>
    %59 = arith.addf %57, %58 : vector<8x32xf32>
    %60 = math.tanh %59 : vector<8x32xf32>
    %61 = arith.mulf %56, %60 : vector<8x32xf32>
    %c0_26 = arith.constant 0 : index
    %c0_27 = arith.constant 0 : index
    %62 = vector.load %arg8[%c0_26, %c0_27] : memref<8x32xf32, #tpu.memory_space<vmem>>, vector<8x32xf32>
    tpu.vector_store %arg8[%c0_26, %c0_27], %59 {strides = array<i32>} : memref<8x32xf32, #tpu.memory_space<vmem>>, vector<8x32xf32>,
    %c0_28 = arith.constant 0 : index
    %c0_29 = arith.constant 0 : index
    %63 = vector.load %arg7[%c0_28, %c0_29] : memref<8x32xf32, #tpu.memory_space<vmem>>, vector<8x32xf32>
    tpu.vector_store %arg7[%c0_28, %c0_29], %61 {strides = array<i32>} : memref<8x32xf32, #tpu.memory_space<vmem>>, vector<8x32xf32>,
    %c2_i32 = arith.constant 2 : i32
    %c0_30 = arith.constant 0 : index
    %c0_31 = arith.constant 0 : index
    %64 = vector.load %arg7[%c0_30, %c0_31] : memref<8x32xf32, #tpu.memory_space<vmem>>, vector<8x32xf32>
    %c0_32 = arith.constant 0 : index
    %c0_33 = arith.constant 0 : index
    %65 = vector.load %arg8[%c0_32, %c0_33] : memref<8x32xf32, #tpu.memory_space<vmem>>, vector<8x32xf32>
    %66 = arith.index_cast %c2_i32 : i32 to index
    %c0_34 = arith.constant 0 : index
    %c0_35 = arith.constant 0 : index
    %67 = vector.load %arg2[%66, %c0_34, %c0_35] : memref<8x8x128xf32, #tpu.memory_space<vmem>>, vector<1x8x128xf32>
    %68 = vector.shape_cast %67 : vector<1x8x128xf32> to vector<8x128xf32>
    %cst_36 = arith.constant dense<0.000000e+00> : vector<8x128xf32>
    %69 = tpu.matmul %64, %3, %cst_36 {dimension_numbers = #tpu.dot_dimension_numbers<[1], [0], [0], [1], [0, 0, 1, 1], [], []>} : vector<8x32xf32>, vector<32x128xf32>, vector<8x128xf32> -> vector<8x128xf32>
    %70 = arith.addf %68, %69 : vector<8x128xf32>
    %cst_37 = arith.constant 5.000000e-01 : f32
    %71 = vector.broadcast %cst_37 : f32 to vector<8x128xf32>
    %72 = arith.mulf %71, %70 : vector<8x128xf32>
    %73 = arith.select %9, %70, %72 : vector<8x128xi1>, vector<8x128xf32>
    %74 = math.tanh %73 : vector<8x128xf32>
    %cst_38 = arith.constant 5.000000e-01 : f32
    %75 = vector.broadcast %cst_38 : f32 to vector<8x128xf32>
    %76 = arith.mulf %75, %74 : vector<8x128xf32>
    %cst_39 = arith.constant 5.000000e-01 : f32
    %77 = vector.broadcast %cst_39 : f32 to vector<8x128xf32>
    %78 = arith.addf %76, %77 : vector<8x128xf32>
    %79 = arith.select %9, %74, %78 : vector<8x128xi1>, vector<8x128xf32>
    %80 = vector.extract_strided_slice %79 {offsets = [0, 0], sizes = [8, 32], strides = [1, 1]} : vector<8x128xf32> to vector<8x32xf32>
    %81 = vector.extract_strided_slice %79 {offsets = [0, 32], sizes = [8, 32], strides = [1, 1]} : vector<8x128xf32> to vector<8x32xf32>
    %82 = vector.extract_strided_slice %79 {offsets = [0, 64], sizes = [8, 32], strides = [1, 1]} : vector<8x128xf32> to vector<8x32xf32>
    %83 = vector.extract_strided_slice %79 {offsets = [0, 96], sizes = [8, 32], strides = [1, 1]} : vector<8x128xf32> to vector<8x32xf32>
    %84 = arith.mulf %81, %65 : vector<8x32xf32>
    %85 = arith.mulf %80, %82 : vector<8x32xf32>
    %86 = arith.addf %84, %85 : vector<8x32xf32>
    %87 = math.tanh %86 : vector<8x32xf32>
    %88 = arith.mulf %83, %87 : vector<8x32xf32>
    %c0_40 = arith.constant 0 : index
    %c0_41 = arith.constant 0 : index
    %89 = vector.load %arg8[%c0_40, %c0_41] : memref<8x32xf32, #tpu.memory_space<vmem>>, vector<8x32xf32>
    tpu.vector_store %arg8[%c0_40, %c0_41], %86 {strides = array<i32>} : memref<8x32xf32, #tpu.memory_space<vmem>>, vector<8x32xf32>,
    %c0_42 = arith.constant 0 : index
    %c0_43 = arith.constant 0 : index
    %90 = vector.load %arg7[%c0_42, %c0_43] : memref<8x32xf32, #tpu.memory_space<vmem>>, vector<8x32xf32>
    tpu.vector_store %arg7[%c0_42, %c0_43], %88 {strides = array<i32>} : memref<8x32xf32, #tpu.memory_space<vmem>>, vector<8x32xf32>,
    %c3_i32 = arith.constant 3 : i32
    %c0_44 = arith.constant 0 : index
    %c0_45 = arith.constant 0 : index
    %91 = vector.load %arg7[%c0_44, %c0_45] : memref<8x32xf32, #tpu.memory_space<vmem>>, vector<8x32xf32>
    %c0_46 = arith.constant 0 : index
    %c0_47 = arith.constant 0 : index
    %92 = vector.load %arg8[%c0_46, %c0_47] : memref<8x32xf32, #tpu.memory_space<vmem>>, vector<8x32xf32>
    %93 = arith.index_cast %c3_i32 : i32 to index
    %c0_48 = arith.constant 0 : index
    %c0_49 = arith.constant 0 : index
    %94 = vector.load %arg2[%93, %c0_48, %c0_49] : memref<8x8x128xf32, #tpu.memory_space<vmem>>, vector<1x8x128xf32>
    %95 = vector.shape_cast %94 : vector<1x8x128xf32> to vector<8x128xf32>
    %cst_50 = arith.constant dense<0.000000e+00> : vector<8x128xf32>
    %96 = tpu.matmul %91, %3, %cst_50 {dimension_numbers = #tpu.dot_dimension_numbers<[1], [0], [0], [1], [0, 0, 1, 1], [], []>} : vector<8x32xf32>, vector<32x128xf32>, vector<8x128xf32> -> vector<8x128xf32>
    %97 = arith.addf %95, %96 : vector<8x128xf32>
    %cst_51 = arith.constant 5.000000e-01 : f32
    %98 = vector.broadcast %cst_51 : f32 to vector<8x128xf32>
    %99 = arith.mulf %98, %97 : vector<8x128xf32>
    %100 = arith.select %9, %97, %99 : vector<8x128xi1>, vector<8x128xf32>
    %101 = math.tanh %100 : vector<8x128xf32>
    %cst_52 = arith.constant 5.000000e-01 : f32
    %102 = vector.broadcast %cst_52 : f32 to vector<8x128xf32>
    %103 = arith.mulf %102, %101 : vector<8x128xf32>
    %cst_53 = arith.constant 5.000000e-01 : f32
    %104 = vector.broadcast %cst_53 : f32 to vector<8x128xf32>
    %105 = arith.addf %103, %104 : vector<8x128xf32>
    %106 = arith.select %9, %101, %105 : vector<8x128xi1>, vector<8x128xf32>
    %107 = vector.extract_strided_slice %106 {offsets = [0, 0], sizes = [8, 32], strides = [1, 1]} : vector<8x128xf32> to vector<8x32xf32>
    %108 = vector.extract_strided_slice %106 {offsets = [0, 32], sizes = [8, 32], strides = [1, 1]} : vector<8x128xf32> to vector<8x32xf32>
    %109 = vector.extract_strided_slice %106 {offsets = [0, 64], sizes = [8, 32], strides = [1, 1]} : vector<8x128xf32> to vector<8x32xf32>
    %110 = vector.extract_strided_slice %106 {offsets = [0, 96], sizes = [8, 32], strides = [1, 1]} : vector<8x128xf32> to vector<8x32xf32>
    %111 = arith.mulf %108, %92 : vector<8x32xf32>
    %112 = arith.mulf %107, %109 : vector<8x32xf32>
    %113 = arith.addf %111, %112 : vector<8x32xf32>
    %114 = math.tanh %113 : vector<8x32xf32>
    %115 = arith.mulf %110, %114 : vector<8x32xf32>
    %c0_54 = arith.constant 0 : index
    %c0_55 = arith.constant 0 : index
    %116 = vector.load %arg8[%c0_54, %c0_55] : memref<8x32xf32, #tpu.memory_space<vmem>>, vector<8x32xf32>
    tpu.vector_store %arg8[%c0_54, %c0_55], %113 {strides = array<i32>} : memref<8x32xf32, #tpu.memory_space<vmem>>, vector<8x32xf32>,
    %c0_56 = arith.constant 0 : index
    %c0_57 = arith.constant 0 : index
    %117 = vector.load %arg7[%c0_56, %c0_57] : memref<8x32xf32, #tpu.memory_space<vmem>>, vector<8x32xf32>
    tpu.vector_store %arg7[%c0_56, %c0_57], %115 {strides = array<i32>} : memref<8x32xf32, #tpu.memory_space<vmem>>, vector<8x32xf32>,
    %c4_i32 = arith.constant 4 : i32
    %c0_58 = arith.constant 0 : index
    %c0_59 = arith.constant 0 : index
    %118 = vector.load %arg7[%c0_58, %c0_59] : memref<8x32xf32, #tpu.memory_space<vmem>>, vector<8x32xf32>
    %c0_60 = arith.constant 0 : index
    %c0_61 = arith.constant 0 : index
    %119 = vector.load %arg8[%c0_60, %c0_61] : memref<8x32xf32, #tpu.memory_space<vmem>>, vector<8x32xf32>
    %120 = arith.index_cast %c4_i32 : i32 to index
    %c0_62 = arith.constant 0 : index
    %c0_63 = arith.constant 0 : index
    %121 = vector.load %arg2[%120, %c0_62, %c0_63] : memref<8x8x128xf32, #tpu.memory_space<vmem>>, vector<1x8x128xf32>
    %122 = vector.shape_cast %121 : vector<1x8x128xf32> to vector<8x128xf32>
    %cst_64 = arith.constant dense<0.000000e+00> : vector<8x128xf32>
    %123 = tpu.matmul %118, %3, %cst_64 {dimension_numbers = #tpu.dot_dimension_numbers<[1], [0], [0], [1], [0, 0, 1, 1], [], []>} : vector<8x32xf32>, vector<32x128xf32>, vector<8x128xf32> -> vector<8x128xf32>
    %124 = arith.addf %122, %123 : vector<8x128xf32>
    %cst_65 = arith.constant 5.000000e-01 : f32
    %125 = vector.broadcast %cst_65 : f32 to vector<8x128xf32>
    %126 = arith.mulf %125, %124 : vector<8x128xf32>
    %127 = arith.select %9, %124, %126 : vector<8x128xi1>, vector<8x128xf32>
    %128 = math.tanh %127 : vector<8x128xf32>
    %cst_66 = arith.constant 5.000000e-01 : f32
    %129 = vector.broadcast %cst_66 : f32 to vector<8x128xf32>
    %130 = arith.mulf %129, %128 : vector<8x128xf32>
    %cst_67 = arith.constant 5.000000e-01 : f32
    %131 = vector.broadcast %cst_67 : f32 to vector<8x128xf32>
    %132 = arith.addf %130, %131 : vector<8x128xf32>
    %133 = arith.select %9, %128, %132 : vector<8x128xi1>, vector<8x128xf32>
    %134 = vector.extract_strided_slice %133 {offsets = [0, 0], sizes = [8, 32], strides = [1, 1]} : vector<8x128xf32> to vector<8x32xf32>
    %135 = vector.extract_strided_slice %133 {offsets = [0, 32], sizes = [8, 32], strides = [1, 1]} : vector<8x128xf32> to vector<8x32xf32>
    %136 = vector.extract_strided_slice %133 {offsets = [0, 64], sizes = [8, 32], strides = [1, 1]} : vector<8x128xf32> to vector<8x32xf32>
    %137 = vector.extract_strided_slice %133 {offsets = [0, 96], sizes = [8, 32], strides = [1, 1]} : vector<8x128xf32> to vector<8x32xf32>
    %138 = arith.mulf %135, %119 : vector<8x32xf32>
    %139 = arith.mulf %134, %136 : vector<8x32xf32>
    %140 = arith.addf %138, %139 : vector<8x32xf32>
    %141 = math.tanh %140 : vector<8x32xf32>
    %142 = arith.mulf %137, %141 : vector<8x32xf32>
    %c0_68 = arith.constant 0 : index
    %c0_69 = arith.constant 0 : index
    %143 = vector.load %arg8[%c0_68, %c0_69] : memref<8x32xf32, #tpu.memory_space<vmem>>, vector<8x32xf32>
    tpu.vector_store %arg8[%c0_68, %c0_69], %140 {strides = array<i32>} : memref<8x32xf32, #tpu.memory_space<vmem>>, vector<8x32xf32>,
    %c0_70 = arith.constant 0 : index
    %c0_71 = arith.constant 0 : index
    %144 = vector.load %arg7[%c0_70, %c0_71] : memref<8x32xf32, #tpu.memory_space<vmem>>, vector<8x32xf32>
    tpu.vector_store %arg7[%c0_70, %c0_71], %142 {strides = array<i32>} : memref<8x32xf32, #tpu.memory_space<vmem>>, vector<8x32xf32>,
    %c5_i32 = arith.constant 5 : i32
    %c0_72 = arith.constant 0 : index
    %c0_73 = arith.constant 0 : index
    %145 = vector.load %arg7[%c0_72, %c0_73] : memref<8x32xf32, #tpu.memory_space<vmem>>, vector<8x32xf32>
    %c0_74 = arith.constant 0 : index
    %c0_75 = arith.constant 0 : index
    %146 = vector.load %arg8[%c0_74, %c0_75] : memref<8x32xf32, #tpu.memory_space<vmem>>, vector<8x32xf32>
    %147 = arith.index_cast %c5_i32 : i32 to index
    %c0_76 = arith.constant 0 : index
    %c0_77 = arith.constant 0 : index
    %148 = vector.load %arg2[%147, %c0_76, %c0_77] : memref<8x8x128xf32, #tpu.memory_space<vmem>>, vector<1x8x128xf32>
    %149 = vector.shape_cast %148 : vector<1x8x128xf32> to vector<8x128xf32>
    %cst_78 = arith.constant dense<0.000000e+00> : vector<8x128xf32>
    %150 = tpu.matmul %145, %3, %cst_78 {dimension_numbers = #tpu.dot_dimension_numbers<[1], [0], [0], [1], [0, 0, 1, 1], [], []>} : vector<8x32xf32>, vector<32x128xf32>, vector<8x128xf32> -> vector<8x128xf32>
    %151 = arith.addf %149, %150 : vector<8x128xf32>
    %cst_79 = arith.constant 5.000000e-01 : f32
    %152 = vector.broadcast %cst_79 : f32 to vector<8x128xf32>
    %153 = arith.mulf %152, %151 : vector<8x128xf32>
    %154 = arith.select %9, %151, %153 : vector<8x128xi1>, vector<8x128xf32>
    %155 = math.tanh %154 : vector<8x128xf32>
    %cst_80 = arith.constant 5.000000e-01 : f32
    %156 = vector.broadcast %cst_80 : f32 to vector<8x128xf32>
    %157 = arith.mulf %156, %155 : vector<8x128xf32>
    %cst_81 = arith.constant 5.000000e-01 : f32
    %158 = vector.broadcast %cst_81 : f32 to vector<8x128xf32>
    %159 = arith.addf %157, %158 : vector<8x128xf32>
    %160 = arith.select %9, %155, %159 : vector<8x128xi1>, vector<8x128xf32>
    %161 = vector.extract_strided_slice %160 {offsets = [0, 0], sizes = [8, 32], strides = [1, 1]} : vector<8x128xf32> to vector<8x32xf32>
    %162 = vector.extract_strided_slice %160 {offsets = [0, 32], sizes = [8, 32], strides = [1, 1]} : vector<8x128xf32> to vector<8x32xf32>
    %163 = vector.extract_strided_slice %160 {offsets = [0, 64], sizes = [8, 32], strides = [1, 1]} : vector<8x128xf32> to vector<8x32xf32>
    %164 = vector.extract_strided_slice %160 {offsets = [0, 96], sizes = [8, 32], strides = [1, 1]} : vector<8x128xf32> to vector<8x32xf32>
    %165 = arith.mulf %162, %146 : vector<8x32xf32>
    %166 = arith.mulf %161, %163 : vector<8x32xf32>
    %167 = arith.addf %165, %166 : vector<8x32xf32>
    %168 = math.tanh %167 : vector<8x32xf32>
    %169 = arith.mulf %164, %168 : vector<8x32xf32>
    %c0_82 = arith.constant 0 : index
    %c0_83 = arith.constant 0 : index
    %170 = vector.load %arg8[%c0_82, %c0_83] : memref<8x32xf32, #tpu.memory_space<vmem>>, vector<8x32xf32>
    tpu.vector_store %arg8[%c0_82, %c0_83], %167 {strides = array<i32>} : memref<8x32xf32, #tpu.memory_space<vmem>>, vector<8x32xf32>,
    %c0_84 = arith.constant 0 : index
    %c0_85 = arith.constant 0 : index
    %171 = vector.load %arg7[%c0_84, %c0_85] : memref<8x32xf32, #tpu.memory_space<vmem>>, vector<8x32xf32>
    tpu.vector_store %arg7[%c0_84, %c0_85], %169 {strides = array<i32>} : memref<8x32xf32, #tpu.memory_space<vmem>>, vector<8x32xf32>,
    %c6_i32 = arith.constant 6 : i32
    %c0_86 = arith.constant 0 : index
    %c0_87 = arith.constant 0 : index
    %172 = vector.load %arg7[%c0_86, %c0_87] : memref<8x32xf32, #tpu.memory_space<vmem>>, vector<8x32xf32>
    %c0_88 = arith.constant 0 : index
    %c0_89 = arith.constant 0 : index
    %173 = vector.load %arg8[%c0_88, %c0_89] : memref<8x32xf32, #tpu.memory_space<vmem>>, vector<8x32xf32>
    %174 = arith.index_cast %c6_i32 : i32 to index
    %c0_90 = arith.constant 0 : index
    %c0_91 = arith.constant 0 : index
    %175 = vector.load %arg2[%174, %c0_90, %c0_91] : memref<8x8x128xf32, #tpu.memory_space<vmem>>, vector<1x8x128xf32>
    %176 = vector.shape_cast %175 : vector<1x8x128xf32> to vector<8x128xf32>
    %cst_92 = arith.constant dense<0.000000e+00> : vector<8x128xf32>
    %177 = tpu.matmul %172, %3, %cst_92 {dimension_numbers = #tpu.dot_dimension_numbers<[1], [0], [0], [1], [0, 0, 1, 1], [], []>} : vector<8x32xf32>, vector<32x128xf32>, vector<8x128xf32> -> vector<8x128xf32>
    %178 = arith.addf %176, %177 : vector<8x128xf32>
    %cst_93 = arith.constant 5.000000e-01 : f32
    %179 = vector.broadcast %cst_93 : f32 to vector<8x128xf32>
    %180 = arith.mulf %179, %178 : vector<8x128xf32>
    %181 = arith.select %9, %178, %180 : vector<8x128xi1>, vector<8x128xf32>
    %182 = math.tanh %181 : vector<8x128xf32>
    %cst_94 = arith.constant 5.000000e-01 : f32
    %183 = vector.broadcast %cst_94 : f32 to vector<8x128xf32>
    %184 = arith.mulf %183, %182 : vector<8x128xf32>
    %cst_95 = arith.constant 5.000000e-01 : f32
    %185 = vector.broadcast %cst_95 : f32 to vector<8x128xf32>
    %186 = arith.addf %184, %185 : vector<8x128xf32>
    %187 = arith.select %9, %182, %186 : vector<8x128xi1>, vector<8x128xf32>
    %188 = vector.extract_strided_slice %187 {offsets = [0, 0], sizes = [8, 32], strides = [1, 1]} : vector<8x128xf32> to vector<8x32xf32>
    %189 = vector.extract_strided_slice %187 {offsets = [0, 32], sizes = [8, 32], strides = [1, 1]} : vector<8x128xf32> to vector<8x32xf32>
    %190 = vector.extract_strided_slice %187 {offsets = [0, 64], sizes = [8, 32], strides = [1, 1]} : vector<8x128xf32> to vector<8x32xf32>
    %191 = vector.extract_strided_slice %187 {offsets = [0, 96], sizes = [8, 32], strides = [1, 1]} : vector<8x128xf32> to vector<8x32xf32>
    %192 = arith.mulf %189, %173 : vector<8x32xf32>
    %193 = arith.mulf %188, %190 : vector<8x32xf32>
    %194 = arith.addf %192, %193 : vector<8x32xf32>
    %195 = math.tanh %194 : vector<8x32xf32>
    %196 = arith.mulf %191, %195 : vector<8x32xf32>
    %c0_96 = arith.constant 0 : index
    %c0_97 = arith.constant 0 : index
    %197 = vector.load %arg8[%c0_96, %c0_97] : memref<8x32xf32, #tpu.memory_space<vmem>>, vector<8x32xf32>
    tpu.vector_store %arg8[%c0_96, %c0_97], %194 {strides = array<i32>} : memref<8x32xf32, #tpu.memory_space<vmem>>, vector<8x32xf32>,
    %c0_98 = arith.constant 0 : index
    %c0_99 = arith.constant 0 : index
    %198 = vector.load %arg7[%c0_98, %c0_99] : memref<8x32xf32, #tpu.memory_space<vmem>>, vector<8x32xf32>
    tpu.vector_store %arg7[%c0_98, %c0_99], %196 {strides = array<i32>} : memref<8x32xf32, #tpu.memory_space<vmem>>, vector<8x32xf32>,
    %c7_i32 = arith.constant 7 : i32
    %c0_100 = arith.constant 0 : index
    %c0_101 = arith.constant 0 : index
    %199 = vector.load %arg7[%c0_100, %c0_101] : memref<8x32xf32, #tpu.memory_space<vmem>>, vector<8x32xf32>
    %c0_102 = arith.constant 0 : index
    %c0_103 = arith.constant 0 : index
    %200 = vector.load %arg8[%c0_102, %c0_103] : memref<8x32xf32, #tpu.memory_space<vmem>>, vector<8x32xf32>
    %201 = arith.index_cast %c7_i32 : i32 to index
    %c0_104 = arith.constant 0 : index
    %c0_105 = arith.constant 0 : index
    %202 = vector.load %arg2[%201, %c0_104, %c0_105] : memref<8x8x128xf32, #tpu.memory_space<vmem>>, vector<1x8x128xf32>
    %203 = vector.shape_cast %202 : vector<1x8x128xf32> to vector<8x128xf32>
    %cst_106 = arith.constant dense<0.000000e+00> : vector<8x128xf32>
    %204 = tpu.matmul %199, %3, %cst_106 {dimension_numbers = #tpu.dot_dimension_numbers<[1], [0], [0], [1], [0, 0, 1, 1], [], []>} : vector<8x32xf32>, vector<32x128xf32>, vector<8x128xf32> -> vector<8x128xf32>
    %205 = arith.addf %203, %204 : vector<8x128xf32>
    %cst_107 = arith.constant 5.000000e-01 : f32
    %206 = vector.broadcast %cst_107 : f32 to vector<8x128xf32>
    %207 = arith.mulf %206, %205 : vector<8x128xf32>
    %208 = arith.select %9, %205, %207 : vector<8x128xi1>, vector<8x128xf32>
    %209 = math.tanh %208 : vector<8x128xf32>
    %cst_108 = arith.constant 5.000000e-01 : f32
    %210 = vector.broadcast %cst_108 : f32 to vector<8x128xf32>
    %211 = arith.mulf %210, %209 : vector<8x128xf32>
    %cst_109 = arith.constant 5.000000e-01 : f32
    %212 = vector.broadcast %cst_109 : f32 to vector<8x128xf32>
    %213 = arith.addf %211, %212 : vector<8x128xf32>
    %214 = arith.select %9, %209, %213 : vector<8x128xi1>, vector<8x128xf32>
    %215 = vector.extract_strided_slice %214 {offsets = [0, 0], sizes = [8, 32], strides = [1, 1]} : vector<8x128xf32> to vector<8x32xf32>
    %216 = vector.extract_strided_slice %214 {offsets = [0, 32], sizes = [8, 32], strides = [1, 1]} : vector<8x128xf32> to vector<8x32xf32>
    %217 = vector.extract_strided_slice %214 {offsets = [0, 64], sizes = [8, 32], strides = [1, 1]} : vector<8x128xf32> to vector<8x32xf32>
    %218 = vector.extract_strided_slice %214 {offsets = [0, 96], sizes = [8, 32], strides = [1, 1]} : vector<8x128xf32> to vector<8x32xf32>
    %219 = arith.mulf %216, %200 : vector<8x32xf32>
    %220 = arith.mulf %215, %217 : vector<8x32xf32>
    %221 = arith.addf %219, %220 : vector<8x32xf32>
    %222 = math.tanh %221 : vector<8x32xf32>
    %223 = arith.mulf %218, %222 : vector<8x32xf32>
    %c0_110 = arith.constant 0 : index
    %c0_111 = arith.constant 0 : index
    %224 = vector.load %arg8[%c0_110, %c0_111] : memref<8x32xf32, #tpu.memory_space<vmem>>, vector<8x32xf32>
    tpu.vector_store %arg8[%c0_110, %c0_111], %221 {strides = array<i32>} : memref<8x32xf32, #tpu.memory_space<vmem>>, vector<8x32xf32>,
    %c0_112 = arith.constant 0 : index
    %c0_113 = arith.constant 0 : index
    %225 = vector.load %arg7[%c0_112, %c0_113] : memref<8x32xf32, #tpu.memory_space<vmem>>, vector<8x32xf32>
    tpu.vector_store %arg7[%c0_112, %c0_113], %223 {strides = array<i32>} : memref<8x32xf32, #tpu.memory_space<vmem>>, vector<8x32xf32>,
    %c8_i32 = arith.constant 8 : i32
    %c0_i32_114 = arith.constant 0 : i32
    %226 = arith.cmpi eq, %arg1, %c0_i32_114 : i32
    %227 = arith.extui %226 : i1 to i32
    %c0_i32_115 = arith.constant 0 : i32
    %228 = arith.cmpi ne, %227, %c0_i32_115 : i32
    scf.if %228 {
      %c0_116 = arith.constant 0 : index
      %c0_117 = arith.constant 0 : index
      %229 = vector.load %arg7[%c0_116, %c0_117] : memref<8x32xf32, #tpu.memory_space<vmem>>, vector<8x32xf32>
      %c0_118 = arith.constant 0 : index
      %c0_119 = arith.constant 0 : index
      %230 = vector.load %arg4[%c0_118, %c0_119] : memref<32x128xf32, #tpu.memory_space<vmem>>, vector<32x128xf32>
      %cst_120 = arith.constant dense<0.000000e+00> : vector<8x128xf32>
      %231 = tpu.matmul %229, %230, %cst_120 {dimension_numbers = #tpu.dot_dimension_numbers<[1], [0], [0], [1], [0, 0, 1, 1], [], []>} : vector<8x32xf32>, vector<32x128xf32>, vector<8x128xf32> -> vector<8x128xf32>
      %c0_121 = arith.constant 0 : index
      %c0_122 = arith.constant 0 : index
      %232 = vector.load %arg5[%c0_121, %c0_122] : memref<1x128xf32, #tpu.memory_space<vmem>>, vector<1x128xf32>
      %233 = vector.broadcast %232 : vector<1x128xf32> to vector<8x128xf32>
      %234 = arith.addf %231, %233 : vector<8x128xf32>
      %c0_123 = arith.constant 0 : index
      %c0_124 = arith.constant 0 : index
      %235 = vector.load %arg6[%c0_123, %c0_124] : memref<8x128xf32, #tpu.memory_space<vmem>>, vector<8x128xf32>
      tpu.vector_store %arg6[%c0_123, %c0_124], %234 {strides = array<i32>} : memref<8x128xf32, #tpu.memory_space<vmem>>, vector<8x128xf32>,
    } else {
    }
    return
  }
  func.func @transform_0(%arg0: i32, %arg1: i32) -> (i32, i32, i32) {
    %c0_i32 = arith.constant 0 : i32
    %c0_i32_0 = arith.constant 0 : i32
    return %arg1, %arg0, %c0_i32 : i32, i32, i32
  }
  func.func @transform_1(%arg0: i32, %arg1: i32) -> (i32, i32) {
    %c0_i32 = arith.constant 0 : i32
    %c0_i32_0 = arith.constant 0 : i32
    %c0_i32_1 = arith.constant 0 : i32
    return %c0_i32, %c0_i32_0 : i32, i32
  }
  func.func @transform_2(%arg0: i32, %arg1: i32) -> (i32, i32) {
    %c0_i32 = arith.constant 0 : i32
    %c0_i32_0 = arith.constant 0 : i32
    %c0_i32_1 = arith.constant 0 : i32
    return %c0_i32, %c0_i32_0 : i32, i32
  }
  func.func @transform_3(%arg0: i32, %arg1: i32) -> (i32, i32) {
    %c0_i32 = arith.constant 0 : i32
    %c0_i32_0 = arith.constant 0 : i32
    %c0_i32_1 = arith.constant 0 : i32
    return %c0_i32, %c0_i32_0 : i32, i32
  }
  func.func @transform_4(%arg0: i32, %arg1: i32) -> (i32, i32) {
    %c0_i32 = arith.constant 0 : i32
    %c0_i32_0 = arith.constant 0 : i32
    return %arg0, %c0_i32 : i32, i32
  }
}

</mosaic_0001>

<bundles_post_ra>
// kernel: email_classifier_forward.1
= control target key start
LH: loop header
LB: loop body
LE: loop exit
PB: predicated region body
PF: predicated region fallthrough
CT: control target
= control target key end

     0   :  { %vm21_vm0 = vcmask 261120   ;;  %v1299_v0 = vmov 0.0|0.0   ;;  %vm1300_vm1 = vmmov 0   ;;  %v1301_v4 = vmov 0.0   ;;  %s1302_s24 = smov 64   ;;  %s1303_s25 = smov 32   ;;  %s1553_s1 = inlined_call_operand.vmem [shape: f32[32,128], index: 1, kind: input, shape index: {}]   ;;  %s1554_s0 = inlined_call_operand.vmem [shape: f32[8,8,128], index: 0, kind: input, shape index: {}]   ;;  %s1555_s2 = inlined_call_operand.vmem [shape: f32[32,128], index: 2, kind: input, shape index: {}]   ;;  %s1556_s3 = inlined_call_operand.vmem [shape: f32[1,128], index: 3, kind: input, shape index: {}]   ;;  %s1557_s4 = inlined_call_operand.vmem [shape: f32[8,128], index: 4, kind: output, shape index: {}]  }
   0x1   :  { %1207 = vmatprep.subr.bf16.mxu0 %v1299_v0  ;;  %v24_v1 = vld [vmem:[%s1553_s1] sm:$0xff]  ;;  %v25_v2 = vld [vmem:[%s1553_s1 + $0x8] sm:$0xff]  ;;  %v26_v3 = vld [vmem:[%s1553_s1 + $0x10] sm:$0xff]  ;;  %1116 = vmatprep.mubr.msk.f32.mxu0 %vm1300_vm1, %v1301_v4  ;;  %22 = vst.msk [vmem:[#allocation2] sm:$0xff] %vm21_vm0, %v1301_v4  ;;  %v28_v9 = vlaneseq  ;;  %s1304_s26 = smov 96  }
   0x2   :  { %23 = vst.msk [vmem:[#allocation3] sm:$0xff] %vm21_vm0, %v1301_v4  ;;  %v1346_v5 = vpack.c.bf16 %v25_v2, %v24_v1  ;;  %v27_v6 = vld [vmem:[%s1553_s1 + $0x18] sm:$0xff]  ;;  %1213 = vmatprep.subr.bf16.mxu1 %v1299_v0  ;;  %1127 = vmatprep.mubr.msk.f32.mxu1 %vm1300_vm1, %v1301_v4  ;;  %v35_v11 = vld [vmem:[%s1554_s0] sm:$0xff]  ;;  %v1047_v36 = vld [vmem:[%s1554_s0 + $0x8] sm:$0xff] }
   0x3   :  { %v1355_v7 = vpack.c.bf16 %v27_v6, %v26_v3  ;;  %v29_v10 = vand.u32 127, %v28_v9  ;;  %v1049_v59 = vld [vmem:[%s1554_s0 + $0x10] sm:$0xff]  ;;  %v957_v15 = vld [vmem:[%s1555_s2] sm:$0xff] }
   0x4   :  { %1209 = vmatpush3.bf16.msra.mxu0 %v1346_v5  ;;  %1215 = vmatpush3.bf16.msra.mxu1 %v1346_v5 }
   0x5   :  { %1210 = vmatprep.subr.bf16.mxu0 %v1299_v0  ;;  %1216 = vmatprep.subr.bf16.mxu1 %v1299_v0  ;;  %vm30_vm2 = vcmp.ge.s32.totalorder %v29_v10, 64  ;;  %vm31_vm3 = vcmp.lt.s32.totalorder %v29_v10, 96 }
   0x6   :  { %vm1374_vm4 = vmand %vm30_vm2, %vm31_vm3 }
   0x8   :  { %1212 = vmatpush3.bf16.msra.mxu0 %v1355_v7  ;;  %v33_v8 = vld [vmem:[#allocation2] sm:$0xff]  ;;  %1218 = vmatpush3.bf16.msra.mxu1 %v1355_v7 }
   0x9   :  { %1219 = vmatprep.subr.bf16.mxu0 %v1299_v0  ;;  %1225 = vmatprep.subr.bf16.mxu1 %v1299_v0  ;;  %v34_v22 = vld [vmem:[#allocation3] sm:$0xff] }
   0xb   :  { %1117 = vmatmul.mubr.msk.f32.vlgmr.msra.gmra.mrb[0].mxu0 %vm21_vm0, %v33_v8 }
   0xc   :  { %1221 = vmatpush3.bf16.msra.mxu0 %v1346_v5  ;;  %1138 = vmatprep.mubr.msk.f32.mxu0 %vm1300_vm1, %v1301_v4 }
   0xd   :  { %1222 = vmatprep.subr.bf16.mxu0 %v1299_v0 }
  0x10   :  { %1224 = vmatpush3.bf16.msra.mxu0 %v1355_v7 }
  0x11   :  { %1231 = vmatprep.subr.bf16.mxu0 %v1299_v0 }
  0xde   :  { %v106_v12 = vpop.f32.mrb[0].mxu0 }
  0xdf   :  { %v110_v13 = vadd.f32 %v106_v12, %v35_v11  ;;  %v1118_v14 = vpop.f32.mrb[1].mxu0 }
  0xe1   :  { %v111_v16 = vmul.f32 0.5, %v110_v13 }
  0xe3   :  { %v112_v17 = vsel %vm1374_vm4, %v110_v13, %v111_v16 }
  0xe4   :  { %1267 = vtanh.f32 %v112_v17 }
  0xee   :  { %v1268_v18 = vpop.eup %1267 }
  0xef   :  { %v114_v19 = vmul.f32 0.5, %v1268_v18 }
  0xf1   :  { %v115_v20 = vadd.f32 0.5, %v114_v19 }
  0xf3   :  { %v116_v21 = vsel %vm1374_vm4, %v1268_v18, %v115_v20 }
  0xf4   :  { %123 = vrot.lane.b32.xlu0 %v116_v21, %s1302_s24 }
  0xf8   :  { %118 = vrot.lane.b32.xlu0 %v34_v22, %s1303_s25 }
 0x166   :  { %v124_v23 = vpop.permute.xlu0 %123 }
 0x167   :  { %v126_v24 = vmul.f32 %v124_v23, %v116_v21  ;;  %v1051_v23 = vld [vmem:[%s1554_s0 + $0x18] sm:$0xff] }
 0x169   :  { %128 = vrot.lane.b32.xlu1 %v126_v24, %s1303_s25 }
 0x16a   :  { %v119_v25 = vpop.permute.xlu0 %118 }
 0x16b   :  { %v121_v26 = vmul.f32 %v119_v25, %v116_v21 }
 0x1db   :  { %v129_v27 = vpop.permute.xlu1 %128 }
 0x1dc   :  { %v131_v28 = vadd.f32 %v129_v27, %v121_v26 }
 0x1de   :  { %1269 = vtanh.f32 %v131_v28 }
 0x1e8   :  { %v1270_v29 = vpop.eup %1269 }
 0x1e9   :  { %134 = vrot.lane.b32.xlu1 %v1270_v29, %s1302_s24 }
 0x1ed   :  { %139 = vrot.lane.b32.xlu1 %v131_v28, %s1304_s26 }
 0x25b   :  { %v135_v30 = vpop.permute.xlu1 %134 }
 0x25c   :  { %v137_v31 = vmul.f32 %v135_v30, %v116_v21 }
 0x25e   :  { %144 = vrot.lane.b32.xlu0 %v137_v31, %s1303_s25 }
 0x25f   :  { %v140_v32 = vpop.permute.xlu1 %139 }
 0x260   :  { %142 = vst.msk [vmem:[#allocation3] sm:$0xff] %vm21_vm0, %v140_v32 }
 0x267   :  { %v149_v33 = vld [vmem:[#allocation3] sm:$0xff] }
 0x268   :  { %233 = vrot.lane.b32.xlu1 %v149_v33, %s1303_s25 }
 0x2d0   :  { %v145_v34 = vpop.permute.xlu0 %144 }
 0x2d1   :  { %147 = vst.msk [vmem:[#allocation2] sm:$0xff] %vm21_vm0, %v145_v34 }
 0x2d8   :  { %v148_v35 = vld [vmem:[#allocation2] sm:$0xff] }
 0x2d9   :  { %1128 = vmatmul.mubr.msk.f32.vlgmr.msra.gmra.mrb[0].mxu1 %vm21_vm0, %v148_v35 }
 0x2da   :  { %1227 = vmatpush3.bf16.msra.mxu1 %v1346_v5  ;;  %1149 = vmatprep.mubr.msk.f32.mxu1 %vm1300_vm1, %v1301_v4  ;;  %v234_v48 = vpop.permute.xlu1 %233 }
 0x2db   :  { %1228 = vmatprep.subr.bf16.mxu1 %v1299_v0 }
 0x2de   :  { %1230 = vmatpush3.bf16.msra.mxu1 %v1355_v7 }
 0x2df   :  { %1237 = vmatprep.subr.bf16.mxu1 %v1299_v0 }
 0x3ac   :  { %v221_v37 = vpop.f32.mrb[0].mxu1 }
 0x3ad   :  { %v225_v38 = vadd.f32 %v1047_v36, %v221_v37  ;;  %v1129_v39 = vpop.f32.mrb[1].mxu1 }
 0x3af   :  { %v226_v40 = vmul.f32 0.5, %v225_v38 }
 0x3b1   :  { %v227_v41 = vsel %vm1374_vm4, %v225_v38, %v226_v40 }
 0x3b2   :  { %1271 = vtanh.f32 %v227_v41 }
 0x3bc   :  { %v1272_v42 = vpop.eup %1271 }
 0x3bd   :  { %v229_v43 = vmul.f32 0.5, %v1272_v42 }
 0x3bf   :  { %v230_v44 = vadd.f32 0.5, %v229_v43 }
 0x3c1   :  { %v231_v45 = vsel %vm1374_vm4, %v1272_v42, %v230_v44 }
 0x3c2   :  { %238 = vrot.lane.b32.xlu0 %v231_v45, %s1302_s24  ;;  %v236_v49 = vmul.f32 %v234_v48, %v231_v45 }
 0x434   :  { %v239_v46 = vpop.permute.xlu0 %238 }
 0x435   :  { %v241_v47 = vmul.f32 %v239_v46, %v231_v45  ;;  %v1053_v46 = vld [vmem:[%s1554_s0 + $0x20] sm:$0xff] }
 0x437   :  { %243 = vrot.lane.b32.xlu0 %v241_v47, %s1303_s25 }
 0x4a9   :  { %v244_v50 = vpop.permute.xlu0 %243 }
 0x4aa   :  { %v246_v51 = vadd.f32 %v244_v50, %v236_v49 }
 0x4ac   :  { %1273 = vtanh.f32 %v246_v51 }
 0x4b6   :  { %v1274_v52 = vpop.eup %1273 }
 0x4b7   :  { %249 = vrot.lane.b32.xlu1 %v1274_v52, %s1302_s24 }
 0x4bb   :  { %254 = vrot.lane.b32.xlu1 %v246_v51, %s1304_s26 }
 0x529   :  { %v250_v53 = vpop.permute.xlu1 %249 }
 0x52a   :  { %v252_v54 = vmul.f32 %v250_v53, %v231_v45 }
 0x52c   :  { %259 = vrot.lane.b32.xlu0 %v252_v54, %s1303_s25 }
 0x52d   :  { %v255_v55 = vpop.permute.xlu1 %254 }
 0x52e   :  { %257 = vst.msk [vmem:[#allocation3] sm:$0xff] %vm21_vm0, %v255_v55 }
 0x535   :  { %v264_v56 = vld [vmem:[#allocation3] sm:$0xff] }
 0x536   :  { %348 = vrot.lane.b32.xlu1 %v264_v56, %s1303_s25 }
 0x59e   :  { %v260_v57 = vpop.permute.xlu0 %259 }
 0x59f   :  { %262 = vst.msk [vmem:[#allocation2] sm:$0xff] %vm21_vm0, %v260_v57 }
 0x5a6   :  { %v263_v58 = vld [vmem:[#allocation2] sm:$0xff] }
 0x5a7   :  { %1139 = vmatmul.mubr.msk.f32.vlgmr.msra.gmra.mrb[2].mxu0 %vm21_vm0, %v263_v58 }
 0x5a8   :  { %1233 = vmatpush3.bf16.msra.mxu0 %v1346_v5  ;;  %1160 = vmatprep.mubr.msk.f32.mxu0 %vm1300_vm1, %v1301_v4  ;;  %v349_v11 = vpop.permute.xlu1 %348 }
 0x5a9   :  { %1234 = vmatprep.subr.bf16.mxu0 %v1299_v0 }
 0x5ac   :  { %1236 = vmatpush3.bf16.msra.mxu0 %v1355_v7 }
 0x5ad   :  { %1243 = vmatprep.subr.bf16.mxu0 %v1299_v0 }
 0x67a   :  { %v336_v60 = vpop.f32.mrb[2].mxu0 }
 0x67b   :  { %v340_v61 = vadd.f32 %v1049_v59, %v336_v60  ;;  %v1140_v62 = vpop.f32.mrb[3].mxu0 }
 0x67d   :  { %v341_v63 = vmul.f32 0.5, %v340_v61 }
 0x67f   :  { %v342_v1 = vsel %vm1374_vm4, %v340_v61, %v341_v63 }
 0x680   :  { %1275 = vtanh.f32 %v342_v1 }
 0x68a   :  { %v1276_v2 = vpop.eup %1275 }
 0x68b   :  { %v344_v3 = vmul.f32 0.5, %v1276_v2 }
 0x68d   :  { %v345_v6 = vadd.f32 0.5, %v344_v3 }
 0x68f   :  { %v346_v8 = vsel %vm1374_vm4, %v1276_v2, %v345_v6 }
 0x690   :  { %353 = vrot.lane.b32.xlu0 %v346_v8, %s1302_s24  ;;  %v351_v12 = vmul.f32 %v349_v11, %v346_v8 }
 0x702   :  { %v354_v9 = vpop.permute.xlu0 %353 }
 0x703   :  { %v356_v10 = vmul.f32 %v354_v9, %v346_v8  ;;  %v1055_v9 = vld [vmem:[%s1554_s0 + $0x28] sm:$0xff] }
 0x705   :  { %358 = vrot.lane.b32.xlu0 %v356_v10, %s1303_s25 }
 0x777   :  { %v359_v13 = vpop.permute.xlu0 %358 }
 0x778   :  { %v361_v14 = vadd.f32 %v359_v13, %v351_v12 }
 0x77a   :  { %1277 = vtanh.f32 %v361_v14 }
 0x784   :  { %v1278_v16 = vpop.eup %1277 }
 0x785   :  { %364 = vrot.lane.b32.xlu1 %v1278_v16, %s1302_s24 }
 0x789   :  { %369 = vrot.lane.b32.xlu1 %v361_v14, %s1304_s26 }
 0x7f7   :  { %v365_v17 = vpop.permute.xlu1 %364 }
 0x7f8   :  { %v367_v18 = vmul.f32 %v365_v17, %v346_v8 }
 0x7fa   :  { %374 = vrot.lane.b32.xlu0 %v367_v18, %s1303_s25 }
 0x7fb   :  { %v370_v19 = vpop.permute.xlu1 %369 }
 0x7fc   :  { %372 = vst.msk [vmem:[#allocation3] sm:$0xff] %vm21_vm0, %v370_v19 }
 0x803   :  { %v379_v20 = vld [vmem:[#allocation3] sm:$0xff] }
 0x804   :  { %463 = vrot.lane.b32.xlu1 %v379_v20, %s1303_s25 }
 0x86c   :  { %v375_v21 = vpop.permute.xlu0 %374 }
 0x86d   :  { %377 = vst.msk [vmem:[#allocation2] sm:$0xff] %vm21_vm0, %v375_v21 }
 0x874   :  { %v378_v22 = vld [vmem:[#allocation2] sm:$0xff] }
 0x875   :  { %1150 = vmatmul.mubr.msk.f32.vlgmr.msra.gmra.mrb[2].mxu1 %vm21_vm0, %v378_v22 }
 0x876   :  { %1239 = vmatpush3.bf16.msra.mxu1 %v1346_v5  ;;  %1171 = vmatprep.mubr.msk.f32.mxu1 %vm1300_vm1, %v1301_v4  ;;  %v464_v35 = vpop.permute.xlu1 %463 }
 0x877   :  { %1240 = vmatprep.subr.bf16.mxu1 %v1299_v0 }
 0x87a   :  { %1242 = vmatpush3.bf16.msra.mxu1 %v1355_v7 }
 0x87b   :  { %1249 = vmatprep.subr.bf16.mxu1 %v1299_v0 }
 0x948   :  { %v451_v24 = vpop.f32.mrb[2].mxu1 }
 0x949   :  { %v455_v25 = vadd.f32 %v1051_v23, %v451_v24  ;;  %v1151_v26 = vpop.f32.mrb[3].mxu1 }
 0x94b   :  { %v456_v27 = vmul.f32 0.5, %v455_v25 }
 0x94d   :  { %v457_v28 = vsel %vm1374_vm4, %v455_v25, %v456_v27 }
 0x94e   :  { %1279 = vtanh.f32 %v457_v28 }
 0x958   :  { %v1280_v29 = vpop.eup %1279 }
 0x959   :  { %v459_v30 = vmul.f32 0.5, %v1280_v29 }
 0x95b   :  { %v460_v31 = vadd.f32 0.5, %v459_v30 }
 0x95d   :  { %v461_v32 = vsel %vm1374_vm4, %v1280_v29, %v460_v31  ;;  %v1057_v31 = vld [vmem:[%s1554_s0 + $0x30] sm:$0xff] }
 0x95e   :  { %468 = vrot.lane.b32.xlu0 %v461_v32, %s1302_s24  ;;  %v466_v36 = vmul.f32 %v464_v35, %v461_v32 }
 0x9d0   :  { %v469_v33 = vpop.permute.xlu0 %468 }
 0x9d1   :  { %v471_v34 = vmul.f32 %v469_v33, %v461_v32 }
 0x9d3   :  { %473 = vrot.lane.b32.xlu0 %v471_v34, %s1303_s25 }
 0xa45   :  { %v474_v37 = vpop.permute.xlu0 %473 }
 0xa46   :  { %v476_v38 = vadd.f32 %v474_v37, %v466_v36 }
 0xa48   :  { %1281 = vtanh.f32 %v476_v38 }
 0xa52   :  { %v1282_v39 = vpop.eup %1281 }
 0xa53   :  { %479 = vrot.lane.b32.xlu1 %v1282_v39, %s1302_s24 }
 0xa57   :  { %484 = vrot.lane.b32.xlu1 %v476_v38, %s1304_s26 }
 0xac5   :  { %v480_v40 = vpop.permute.xlu1 %479 }
 0xac6   :  { %v482_v41 = vmul.f32 %v480_v40, %v461_v32 }
 0xac8   :  { %489 = vrot.lane.b32.xlu0 %v482_v41, %s1303_s25 }
 0xac9   :  { %v485_v42 = vpop.permute.xlu1 %484 }
 0xaca   :  { %487 = vst.msk [vmem:[#allocation3] sm:$0xff] %vm21_vm0, %v485_v42 }
 0xad1   :  { %v494_v43 = vld [vmem:[#allocation3] sm:$0xff] }
 0xad2   :  { %578 = vrot.lane.b32.xlu1 %v494_v43, %s1303_s25 }
 0xb3a   :  { %v490_v44 = vpop.permute.xlu0 %489 }
 0xb3b   :  { %492 = vst.msk [vmem:[#allocation2] sm:$0xff] %vm21_vm0, %v490_v44 }
 0xb42   :  { %v493_v45 = vld [vmem:[#allocation2] sm:$0xff] }
 0xb43   :  { %1161 = vmatmul.mubr.msk.f32.vlgmr.msra.gmra.mrb[4].mxu0 %vm21_vm0, %v493_v45 }
 0xb44   :  { %1245 = vmatpush3.bf16.msra.mxu0 %v1346_v5  ;;  %1182 = vmatprep.mubr.msk.f32.mxu0 %vm1300_vm1, %v1301_v4  ;;  %v579_v58 = vpop.permute.xlu1 %578 }
 0xb45   :  { %1246 = vmatprep.subr.bf16.mxu0 %v1299_v0 }
 0xb48   :  { %1248 = vmatpush3.bf16.msra.mxu0 %v1355_v7 }
 0xb49   :  { %1255 = vmatprep.subr.bf16.mxu0 %v1299_v0 }
 0xc16   :  { %v566_v47 = vpop.f32.mrb[4].mxu0 }
 0xc17   :  { %v570_v48 = vadd.f32 %v1053_v46, %v566_v47  ;;  %v1162_v49 = vpop.f32.mrb[5].mxu0 }
 0xc19   :  { %v571_v50 = vmul.f32 0.5, %v570_v48 }
 0xc1b   :  { %v572_v51 = vsel %vm1374_vm4, %v570_v48, %v571_v50 }
 0xc1c   :  { %1283 = vtanh.f32 %v572_v51 }
 0xc26   :  { %v1284_v52 = vpop.eup %1283 }
 0xc27   :  { %v574_v53 = vmul.f32 0.5, %v1284_v52 }
 0xc29   :  { %v575_v54 = vadd.f32 0.5, %v574_v53  ;;  %v1059_v53 = vld [vmem:[%s1554_s0 + $0x38] sm:$0xff] }
 0xc2b   :  { %v576_v55 = vsel %vm1374_vm4, %v1284_v52, %v575_v54 }
 0xc2c   :  { %583 = vrot.lane.b32.xlu0 %v576_v55, %s1302_s24  ;;  %v581_v59 = vmul.f32 %v579_v58, %v576_v55 }
 0xc9e   :  { %v584_v56 = vpop.permute.xlu0 %583 }
 0xc9f   :  { %v586_v57 = vmul.f32 %v584_v56, %v576_v55 }
 0xca1   :  { %588 = vrot.lane.b32.xlu0 %v586_v57, %s1303_s25 }
 0xd13   :  { %v589_v60 = vpop.permute.xlu0 %588 }
 0xd14   :  { %v591_v61 = vadd.f32 %v589_v60, %v581_v59 }
 0xd16   :  { %1285 = vtanh.f32 %v591_v61 }
 0xd20   :  { %v1286_v62 = vpop.eup %1285 }
 0xd21   :  { %594 = vrot.lane.b32.xlu1 %v1286_v62, %s1302_s24 }
 0xd25   :  { %599 = vrot.lane.b32.xlu1 %v591_v61, %s1304_s26 }
 0xd93   :  { %v595_v63 = vpop.permute.xlu1 %594 }
 0xd94   :  { %v597_v1 = vmul.f32 %v595_v63, %v576_v55 }
 0xd96   :  { %604 = vrot.lane.b32.xlu0 %v597_v1, %s1303_s25 }
 0xd97   :  { %v600_v2 = vpop.permute.xlu1 %599 }
 0xd98   :  { %602 = vst.msk [vmem:[#allocation3] sm:$0xff] %vm21_vm0, %v600_v2 }
 0xd9f   :  { %v609_v3 = vld [vmem:[#allocation3] sm:$0xff] }
 0xda0   :  { %693 = vrot.lane.b32.xlu1 %v609_v3, %s1303_s25 }
 0xe08   :  { %v605_v6 = vpop.permute.xlu0 %604 }
 0xe09   :  { %607 = vst.msk [vmem:[#allocation2] sm:$0xff] %vm21_vm0, %v605_v6 }
 0xe10   :  { %v608_v8 = vld [vmem:[#allocation2] sm:$0xff] }
 0xe11   :  { %1172 = vmatmul.mubr.msk.f32.vlgmr.msra.gmra.mrb[4].mxu1 %vm21_vm0, %v608_v8 }
 0xe12   :  { %1251 = vmatpush3.bf16.msra.mxu1 %v1346_v5  ;;  %1193 = vmatprep.mubr.msk.f32.mxu1 %vm1300_vm1, %v1301_v4  ;;  %v694_v20 = vpop.permute.xlu1 %693 }
 0xe13   :  { %1252 = vmatprep.subr.bf16.mxu1 %v1299_v0 }
 0xe16   :  { %1254 = vmatpush3.bf16.msra.mxu1 %v1355_v7 }
 0xee4   :  { %v681_v10 = vpop.f32.mrb[4].mxu1 }
 0xee5   :  { %v685_v11 = vadd.f32 %v1055_v9, %v681_v10  ;;  %v1173_v12 = vpop.f32.mrb[5].mxu1  ;;  %v958_v10 = vld [vmem:[%s1555_s2 + $0x8] sm:$0xff] }
 0xee6   :  { %v959_v12 = vld [vmem:[%s1555_s2 + $0x10] sm:$0xff] }
 0xee7   :  { %v686_v13 = vmul.f32 0.5, %v685_v11 }
 0xee9   :  { %v687_v14 = vsel %vm1374_vm4, %v685_v11, %v686_v13  ;;  %v1256_v11 = vpack.c.bf16 %v958_v10, %v957_v15  ;;  %v960_v13 = vld [vmem:[%s1555_s2 + $0x18] sm:$0xff] }
 0xeea   :  { %1287 = vtanh.f32 %v687_v14  ;;  %v1259_v14 = vpack.c.bf16 %v960_v13, %v959_v12 }
 0xef4   :  { %v1288_v5 = vpop.eup %1287 }
 0xef5   :  { %v689_v16 = vmul.f32 0.5, %v1288_v5 }
 0xef7   :  { %v690_v17 = vadd.f32 0.5, %v689_v16 }
 0xef9   :  { %v691_v18 = vsel %vm1374_vm4, %v1288_v5, %v690_v17 }
 0xefa   :  { %698 = vrot.lane.b32.xlu0 %v691_v18, %s1302_s24  ;;  %v696_v21 = vmul.f32 %v694_v20, %v691_v18 }
 0xf6c   :  { %v699_v7 = vpop.permute.xlu0 %698 }
 0xf6d   :  { %v701_v19 = vmul.f32 %v699_v7, %v691_v18 }
 0xf6f   :  { %703 = vrot.lane.b32.xlu0 %v701_v19, %s1303_s25  ;;  %v1061_v19 = vld [vmem:[%s1556_s3] ss:$0 sm:$0xff] }
 0xfe1   :  { %v704_v22 = vpop.permute.xlu0 %703 }
 0xfe2   :  { %v706_v23 = vadd.f32 %v704_v22, %v696_v21 }
 0xfe4   :  { %1289 = vtanh.f32 %v706_v23 }
 0xfee   :  { %v1290_v24 = vpop.eup %1289 }
 0xfef   :  { %709 = vrot.lane.b32.xlu1 %v1290_v24, %s1302_s24 }
 0xff3   :  { %714 = vrot.lane.b32.xlu1 %v706_v23, %s1304_s26 }
0x1061   :  { %v710_v25 = vpop.permute.xlu1 %709 }
0x1062   :  { %v712_v26 = vmul.f32 %v710_v25, %v691_v18 }
0x1064   :  { %719 = vrot.lane.b32.xlu0 %v712_v26, %s1303_s25 }
0x1065   :  { %v715_v27 = vpop.permute.xlu1 %714 }
0x1066   :  { %717 = vst.msk [vmem:[#allocation3] sm:$0xff] %vm21_vm0, %v715_v27 }
0x106d   :  { %v724_v28 = vld [vmem:[#allocation3] sm:$0xff] }
0x106e   :  { %808 = vrot.lane.b32.xlu1 %v724_v28, %s1303_s25 }
0x10d6   :  { %v720_v29 = vpop.permute.xlu0 %719 }
0x10d7   :  { %722 = vst.msk [vmem:[#allocation2] sm:$0xff] %vm21_vm0, %v720_v29 }
0x10de   :  { %v723_v30 = vld [vmem:[#allocation2] sm:$0xff] }
0x10df   :  { %1183 = vmatmul.mubr.msk.f32.vlgmr.msra.gmra.mrb[6].mxu0 %vm21_vm0, %v723_v30 }
0x10e0   :  { %1204 = vmatprep.mubr.msk.f32.mxu0 %vm1300_vm1, %v1301_v4  ;;  %v809_v42 = vpop.permute.xlu1 %808  ;;  %1257 = vmatpush3.bf16.msra.mxu0 %v1256_v11 }
0x10e1   :  { %1258 = vmatprep.subr.bf16.mxu0 %v1299_v0 }
0x10e4   :  { %1260 = vmatpush3.bf16.msra.mxu0 %v1259_v14 }
0x11b2   :  { %v796_v32 = vpop.f32.mrb[6].mxu0 }
0x11b3   :  { %v800_v33 = vadd.f32 %v1057_v31, %v796_v32  ;;  %v1184_v34 = vpop.f32.mrb[7].mxu0 }
0x11b5   :  { %v801_v35 = vmul.f32 0.5, %v800_v33 }
0x11b7   :  { %v802_v36 = vsel %vm1374_vm4, %v800_v33, %v801_v35 }
0x11b8   :  { %1291 = vtanh.f32 %v802_v36 }
0x11c2   :  { %v1292_v37 = vpop.eup %1291 }
0x11c3   :  { %v804_v38 = vmul.f32 0.5, %v1292_v37 }
0x11c5   :  { %v805_v39 = vadd.f32 0.5, %v804_v38 }
0x11c7   :  { %v806_v40 = vsel %vm1374_vm4, %v1292_v37, %v805_v39 }
0x11c8   :  { %813 = vrot.lane.b32.xlu0 %v806_v40, %s1302_s24  ;;  %v811_v43 = vmul.f32 %v809_v42, %v806_v40 }
0x123a   :  { %v814_v4 = vpop.permute.xlu0 %813 }
0x123b   :  { %v816_v41 = vmul.f32 %v814_v4, %v806_v40 }
0x123d   :  { %818 = vrot.lane.b32.xlu0 %v816_v41, %s1303_s25 }
0x12af   :  { %v819_v44 = vpop.permute.xlu0 %818 }
0x12b0   :  { %v821_v45 = vadd.f32 %v819_v44, %v811_v43 }
0x12b2   :  { %1293 = vtanh.f32 %v821_v45 }
0x12bc   :  { %v1294_v46 = vpop.eup %1293 }
0x12bd   :  { %824 = vrot.lane.b32.xlu1 %v1294_v46, %s1302_s24 }
0x12c1   :  { %829 = vrot.lane.b32.xlu1 %v821_v45, %s1304_s26 }
0x132f   :  { %v825_v47 = vpop.permute.xlu1 %824 }
0x1330   :  { %v827_v48 = vmul.f32 %v825_v47, %v806_v40 }
0x1332   :  { %834 = vrot.lane.b32.xlu0 %v827_v48, %s1303_s25 }
0x1333   :  { %v830_v49 = vpop.permute.xlu1 %829 }
0x1334   :  { %832 = vst.msk [vmem:[#allocation3] sm:$0xff] %vm21_vm0, %v830_v49 }
0x133b   :  { %v839_v50 = vld [vmem:[#allocation3] sm:$0xff] }
0x133c   :  { %923 = vrot.lane.b32.xlu1 %v839_v50, %s1303_s25 }
0x13a4   :  { %v835_v51 = vpop.permute.xlu0 %834 }
0x13a5   :  { %837 = vst.msk [vmem:[#allocation2] sm:$0xff] %vm21_vm0, %v835_v51 }
0x13ac   :  { %v838_v52 = vld [vmem:[#allocation2] sm:$0xff] }
0x13ad   :  { %1194 = vmatmul.mubr.msk.f32.vlgmr.msra.gmra.mrb[6].mxu1 %vm21_vm0, %v838_v52 }
0x13ae   :  { %v924_v2 = vpop.permute.xlu1 %923 }
0x1480   :  { %v911_v54 = vpop.f32.mrb[6].mxu1 }
0x1481   :  { %v915_v55 = vadd.f32 %v1059_v53, %v911_v54  ;;  %v1195_v56 = vpop.f32.mrb[7].mxu1 }
0x1483   :  { %v916_v57 = vmul.f32 0.5, %v915_v55 }
0x1485   :  { %v917_v58 = vsel %vm1374_vm4, %v915_v55, %v916_v57 }
0x1486   :  { %1295 = vtanh.f32 %v917_v58 }
0x1490   :  { %v1296_v59 = vpop.eup %1295 }
0x1491   :  { %v919_v60 = vmul.f32 0.5, %v1296_v59 }
0x1493   :  { %v920_v61 = vadd.f32 0.5, %v919_v60 }
0x1495   :  { %v921_v62 = vsel %vm1374_vm4, %v1296_v59, %v920_v61 }
0x1496   :  { %928 = vrot.lane.b32.xlu0 %v921_v62, %s1302_s24  ;;  %v926_v3 = vmul.f32 %v924_v2, %v921_v62 }
0x1508   :  { %v929_v63 = vpop.permute.xlu0 %928 }
0x1509   :  { %v931_v1 = vmul.f32 %v929_v63, %v921_v62 }
0x150b   :  { %933 = vrot.lane.b32.xlu0 %v931_v1, %s1303_s25 }
0x157d   :  { %v934_v6 = vpop.permute.xlu0 %933 }
0x157e   :  { %v936_v8 = vadd.f32 %v934_v6, %v926_v3 }
0x1580   :  { %1297 = vtanh.f32 %v936_v8 }
0x158a   :  { %v1298_v9 = vpop.eup %1297 }
0x158b   :  { %939 = vrot.lane.b32.xlu1 %v1298_v9, %s1302_s24 }
0x158f   :  { %944 = vrot.lane.b32.xlu1 %v936_v8, %s1304_s26 }
0x15fd   :  { %v940_v5 = vpop.permute.xlu1 %939 }
0x15fe   :  { %v942_v16 = vmul.f32 %v940_v5, %v921_v62 }
0x1600   :  { %949 = vrot.lane.b32.xlu0 %v942_v16, %s1303_s25 }
0x1601   :  { %v945_v17 = vpop.permute.xlu1 %944 }
0x1602   :  { %947 = vst.msk [vmem:[#allocation3] sm:$0xff] %vm21_vm0, %v945_v17 }
0x1672   :  { %v950_v18 = vpop.permute.xlu0 %949 }
0x1673   :  { %952 = vst.msk [vmem:[#allocation2] sm:$0xff] %vm21_vm0, %v950_v18 }
0x167a   :  { %v956_v7 = vld [vmem:[#allocation2] sm:$0xff] }
0x167b   :  { %1205 = vmatmul.mubr.msk.f32.vlgmr.msra.gmra.mrb[8].mxu0 %vm21_vm0, %v956_v7 }
0x174e   :  { %v1037_v20 = vpop.f32.mrb[8].mxu0 }
0x174f   :  { %v1038_v0 = vadd.f32 %v1061_v19, %v1037_v20  ;;  %v1206_v21 = vpop.f32.mrb[9].mxu0 }
0x1751   :  { %1041 = vst [vmem:[%s1557_s4] sm:$0xff] %v1038_v0 }

</bundles_post_ra>
